<compile_context>
chip_gen: v7x
topology: tpu7x:2x2x1
jax: 0.10.0
libtpu: 0.0.40
codegen_flags: <defaults>
</compile_context>

<pallas_src>
import functools
import math

import jax
import jax.numpy as jnp
from jax.experimental import pallas as pl
from jax.experimental.pallas import tpu as pltpu

LANES = 128
_SMALL_SLAB_BYTES = 2 * 1024 * 1024     # below this: single-block, no-grid path
_SMALL_BLOCK_BYTES = 2 * 1024 * 1024    # misaligned whole-array block cap (padded estimate)


def _round_up(a, b):
    return -(-a // b) * b


@functools.lru_cache(maxsize=None)
def _block_params():
    """Generation-aware (block_bytes_per_operand_buffer, vmem_limit_bytes)."""
    try:
        vmem_bytes = int(pltpu.get_tpu_info().vmem_capacity_bytes)
    except Exception:
        vmem_bytes = 64 << 20               # conservative default (v7x per-TC VMEM)
    if vmem_bytes >= (96 << 20):            # v5e / v6e: 128 MiB physical VMEM
        return 8 << 20, 96 << 20            # 3 ops x 2 bufs x 8 MiB = 48 MiB pipelined
    return 6 << 20, 48 << 20                # v7x: 64 MiB/TC -> 36 MiB pipelined + headroom


def _add_kernel(x_ref, y_ref, o_ref):
    # Promotion (if any) happens on the VMEM tile (cheap VPU work hidden under
    # DMA), not as a wrapper-side astype (which would cost an extra HBM pass).
    o_ref[...] = x_ref[...].astype(o_ref.dtype) + y_ref[...].astype(o_ref.dtype)


def _add_scalar_kernel(x_ref, s_ref, o_ref):
    # s_ref is a resident (1, 1) block holding a genuinely-broadcast operand.
    o_ref[...] = x_ref[...].astype(o_ref.dtype) + s_ref[0, 0].astype(o_ref.dtype)


def _cost(n, x, y, out_dtype):
    return pl.CostEstimate(
        flops=n,
        transcendentals=0,
        bytes_accessed=int(x.size) * x.dtype.itemsize
        + int(y.size) * y.dtype.itemsize
        + n * jnp.dtype(out_dtype).itemsize,
    )


def _conservative_block_bytes(shape, itemsize):
    """Upper bound on VMEM bytes for `shape` as a single whole-array block."""
    s = (1,) * max(0, 2 - len(shape)) + tuple(shape)
    lead = math.prod(s[:-2]) if len(s) > 2 else 1
    # sublane tile <= 32 rows (int8/fp8 packing), lane tile 128.
    return lead * _round_up(s[-2], 32) * _round_up(s[-1], LANES) * itemsize


def _add_whole_block(x, y, out_dtype, y_is_scalar):
    """Tiny problems: whole arrays as single VMEM blocks, no grid / pipeline."""
    kernel = _add_scalar_kernel if y_is_scalar else _add_kernel
    return pl.pallas_call(
        kernel,
        out_shape=jax.ShapeDtypeStruct(x.shape, out_dtype),
        cost_estimate=_cost(int(x.size), x, y, out_dtype),
    )(x, y)


def _add_slab(x2d, y, out_dtype, y_is_scalar):
    """x2d is a lane-dense (rows, 128) slab; y is same-shape or a (1, 1) scalar."""
    rows = x2d.shape[0]
    itemsize = max(x2d.dtype.itemsize, y.dtype.itemsize, jnp.dtype(out_dtype).itemsize)
    slab_bytes = rows * LANES * itemsize

    if slab_bytes <= _SMALL_SLAB_BYTES:
        return _add_whole_block(x2d, y, out_dtype, y_is_scalar)

    block_bytes, vmem_limit = _block_params()
    # Multiple of 32 rows so bf16 (16) / int8 & fp8 (32) packed sublane tiles
    # never straddle a block edge.
    block_rows = max(32, (block_bytes // (LANES * itemsize)) // 32 * 32)
    if block_rows >= rows:
        block_rows = rows                   # one full-extent block (always legal)
    nblocks = pl.cdiv(rows, block_rows)
    # Nudge the grid even so v7x's two TensorCores get balanced work.
    # TODO(synk): confirm via trace that the "parallel" axis shards across both
    # v7x TensorCores; fall back to pl.core_map over create_tensorcore_mesh if not.
    if nblocks > 1 and nblocks % 2 == 1:
        block_rows = max(32, _round_up(pl.cdiv(rows, nblocks + 1), 32))
        nblocks = pl.cdiv(rows, block_rows)

    x_spec = pl.BlockSpec((block_rows, LANES), lambda i: (i, 0))
    if y_is_scalar:
        y_spec = pl.BlockSpec((1, 1), lambda i: (0, 0))   # resident broadcast operand
        kernel = _add_scalar_kernel
    else:
        y_spec = pl.BlockSpec((block_rows, LANES), lambda i: (i, 0))
        kernel = _add_kernel

    return pl.pallas_call(
        kernel,
        out_shape=jax.ShapeDtypeStruct((rows, LANES), out_dtype),
        grid_spec=pltpu.PrefetchScalarGridSpec(
            num_scalar_prefetch=0,
            grid=(nblocks,),
            in_specs=[x_spec, y_spec],
            out_specs=pl.BlockSpec((block_rows, LANES), lambda i: (i, 0)),
        ),
        compiler_params=pltpu.CompilerParams(
            dimension_semantics=("parallel",),   # shard grid across v7x's 2 TCs
            vmem_limit_bytes=vmem_limit,         # big blocks compile on v5e's 16 MiB default
        ),
        cost_estimate=_cost(rows * LANES, x2d, y, out_dtype),
    )(x2d, y)


def pallas_add(x, y):
    """Elementwise add matching PyTorch `x + y` semantics (NCHW or any shape)."""
    x = jnp.asarray(x)
    y = jnp.asarray(y)
    out_shape = jnp.broadcast_shapes(x.shape, y.shape)
    out_dtype = jnp.result_type(x.dtype, y.dtype)
    n = math.prod(out_shape) if out_shape else 1
    if n == 0:
        return jnp.zeros(out_shape, out_dtype)

    # ---- broadcast handling --------------------------------------------------
    y_is_scalar = False
    if x.shape != y.shape:
        if y.size == 1 and x.shape == out_shape:
            y_is_scalar = True
            y = y.reshape(1, 1)
        elif x.size == 1 and y.shape == out_shape:
            x, y = y, x.reshape(1, 1)            # add is commutative
            y_is_scalar = True
        else:
            # TODO(synk): feed partially-broadcast operands (e.g. a (C,1,1) bias)
            # through a repeating BlockSpec instead of materializing them.
            x = jnp.broadcast_to(x, out_shape)
            y = jnp.broadcast_to(y, out_shape)

    itemsize_max = max(x.dtype.itemsize, y.dtype.itemsize, jnp.dtype(out_dtype).itemsize)

    # ---- zero-copy lane-dense slab (only 128-alignment required) -------------
    if n % LANES == 0:
        rows = n // LANES
        x2d = x.reshape(rows, LANES)
        y2d = y if y_is_scalar else y.reshape(rows, LANES)
        out2d = _add_slab(x2d, y2d, out_dtype, y_is_scalar)
        return out2d.reshape(out_shape)

    # ---- misaligned (n % 128 != 0): no jnp.pad, no trim -----------------------
    if _conservative_block_bytes(out_shape, itemsize_max) <= _SMALL_BLOCK_BYTES:
        # Small: whole array as one block; Mosaic pads the last two dims inside
        # VMEM only -- no HBM-side padding pass.
        x_nd = x if x.ndim >= 2 else x.reshape((1,) * (2 - x.ndim) + x.shape)
        y_nd = y if y_is_scalar else y.reshape(x_nd.shape)
        out = _add_whole_block(x_nd, y_nd, out_dtype, y_is_scalar)
        return out.reshape(out_shape)

    # Large & misaligned (rare): 128-aligned prefix through the slab kernel,
    # <128-element tail in plain jnp. Costs one extra pass over the output for
    # the concatenate (still far cheaper than pad+trim on both inputs).
    # TODO(synk): a 1-D BlockSpec with a masked ragged last block would remove
    # the remaining prefix-slice / concatenate copies entirely.
    rem = n % LANES
    m = n - rem
    xf = x.reshape(-1)
    yf = y if y_is_scalar else y.reshape(-1)
    main = _add_slab(
        xf[:m].reshape(m // LANES, LANES),
        y if y_is_scalar else yf[:m].reshape(m // LANES, LANES),
        out_dtype,
        y_is_scalar,
    )
    tail_y = y.reshape(()) if y_is_scalar else yf[m:]
    tail = xf[m:].astype(out_dtype) + tail_y.astype(out_dtype)
    return jnp.concatenate([main.reshape(-1), tail]).reshape(out_shape)


if __name__ == "__main__":
    key = jax.random.PRNGKey(0)
    kx, ky, ka, kb, kc, kd = jax.random.split(key, 6)

    # 1) Primary: NCHW batch=2, channels=4, spatial=16x16 (zero-copy slab, no grid).
    x = jax.random.normal(kx, (2, 4, 16, 16), dtype=jnp.float32)
    y = jax.random.normal(ky, (2, 4, 16, 16), dtype=jnp.float32)
    out = pallas_add(x, y)
    jax.block_until_ready(out)
    ref = x + y
    assert out.shape == ref.shape and out.dtype == ref.dtype
    assert jnp.allclose(out, ref, atol=1e-6, rtol=1e-6)

    # 2) Gridded (pipelined) slab path: large enough for multiple grid steps.
    a = jax.random.normal(ka, (8, 64, 128, 64), dtype=jnp.float32)
    b = jax.random.normal(kb, (8, 64, 128, 64), dtype=jnp.float32)
    out2 = pallas_add(a, b)
    jax.block_until_ready(out2)
    ref2 = a + b
    assert out2.shape == ref2.shape and out2.dtype == ref2.dtype
    assert jnp.allclose(out2, ref2, atol=1e-6, rtol=1e-6)

    # 3) Misaligned size (n % 128 != 0): whole-array block, no pad/trim passes.
    c = jax.random.normal(kc, (3, 5, 7, 11), dtype=jnp.float32)
    d = jax.random.normal(kd, (3, 5, 7, 11), dtype=jnp.float32)
    out3 = pallas_add(c, d)
    jax.block_until_ready(out3)
    ref3 = c + d
    assert out3.shape == ref3.shape and out3.dtype == ref3.dtype
    assert jnp.allclose(out3, ref3, atol=1e-6, rtol=1e-6)

    # 4) Genuinely-broadcast scalar operand: fed through a (1,1) block, no
    #    jnp.broadcast_to materialization.
    s = jnp.float32(2.5)
    out4 = pallas_add(x, s)
    jax.block_until_ready(out4)
    ref4 = x + s
    assert out4.shape == ref4.shape and out4.dtype == ref4.dtype
    assert jnp.allclose(out4, ref4, atol=1e-6, rtol=1e-6)

    print("KERNEL_OK")
</pallas_src>

<mosaic_0001>
module attributes {stable_mosaic.version = 11 : i64} {
  func.func @_add_kernel(%arg0: memref<16x128xf32, #tpu.memory_space<vmem>>, %arg1: memref<16x128xf32, #tpu.memory_space<vmem>>, %arg2: memref<16x128xf32, #tpu.memory_space<vmem>>) attributes {dimension_semantics = [], scalar_prefetch = 0 : i64, scratch_operands = 0 : i64, tpu.core_type = #tpu.core_type<tc>} {
    %c0 = arith.constant 0 : index
    %c0_0 = arith.constant 0 : index
    %0 = vector.load %arg0[%c0, %c0_0] : memref<16x128xf32, #tpu.memory_space<vmem>>, vector<16x128xf32>
    %c0_1 = arith.constant 0 : index
    %c0_2 = arith.constant 0 : index
    %1 = vector.load %arg1[%c0_1, %c0_2] : memref<16x128xf32, #tpu.memory_space<vmem>>, vector<16x128xf32>
    %2 = arith.addf %0, %1 : vector<16x128xf32>
    %c0_3 = arith.constant 0 : index
    %c0_4 = arith.constant 0 : index
    %3 = vector.load %arg2[%c0_3, %c0_4] : memref<16x128xf32, #tpu.memory_space<vmem>>, vector<16x128xf32>
    tpu.vector_store %arg2[%c0_3, %c0_4], %2 {strides = array<i32>} : memref<16x128xf32, #tpu.memory_space<vmem>>, vector<16x128xf32>,
    return
  }
}

</mosaic_0001>

<bundles_post_ra>
// kernel: tpu_custom_call.1
= control target key start
LH: loop header
LB: loop body
LE: loop exit
PB: predicated region body
PF: predicated region fallthrough
CT: control target
= control target key end

     0   :  { %7 = vsyncpa [#allocation3], 0  ;;  %s208_s0 = inlined_call_operand.hbm [shape: f32[16,128], index: 0, kind: input, shape index: {}]   ;;  %s209_s1 = inlined_call_operand.hbm [shape: f32[16,128], index: 1, kind: input, shape index: {}]   ;;  %s210_s2 = inlined_call_operand.hbm [shape: f32[16,128], index: 2, kind: output, shape index: {}]  }
   0x1   :  { %8 = vsyncpa [#allocation6], 0 }
   0x2   :  { %9 = vsyncpa [#allocation4], 0  ;;  %s143_s9 = smov [#allocation2]   ;;  %s71_s13 = scalar_lea.hbm %s208_s0, 256 }
   0x3   :  { %s15_s10 = sshll.u32 %s143_s9, 4  ;;  %p72_p0 = scmp.ne.s32.totalorder %s208_s0, %s71_s13  ;;  %s16_s10 = int_to_ptr.vmem [resolvable:$true] %s15_s10 }
   0x4   :  { %p75_p1 = scmp.lt.u32.totalorder %s71_s13, %s208_s0 }
   0x6   :  { %p77_p2 = pnand %p75_p1, %p72_p0 }
   0x8   :  { %80 = shalt.err (!%p77_p2)
}
   0x9   :  { %s81_s18 = scalar_lea.vmem %s16_s10, 256  ;;  %p86_p4 = scmp.lt.s32.totalorder %s16_s10, %s16_s10 }
   0xa   :  { %p82_p3 = scmp.ne.s32.totalorder %s16_s10, %s81_s18  ;;  %p87_p5 = scmp.lt.s32.totalorder %s81_s18, %s81_s18 }
   0xc   :  { %p88_p6 = por %p87_p5, %p86_p4 }
   0xe   :  { %p89_p7 = pnand %p88_p6, %p82_p3 }
  0x10   :  { %92 = shalt.err (!%p89_p7)
}
  0x11   :  { %s144_s19 = smov 128   ;;  %s145_s20 = smov 8  }
  0x12   :  { %21 = dma.hbm_to_vmem [thread:$0]  %s208_s0, 256, %s16_s10, [#allocation3], %s144_s19, %s144_s19, %s145_s20  }
  0x13   :  { %s146_s23 = smov [#allocation5]   ;;  %s93_s27 = scalar_lea.hbm %s209_s1, 256 }
  0x14   :  { %s27_s24 = sshll.u32 %s146_s23, 4  ;;  %p94_p8 = scmp.ne.s32.totalorder %s209_s1, %s93_s27  ;;  %s28_s24 = int_to_ptr.vmem [resolvable:$true] %s27_s24 }
  0x15   :  { %p97_p9 = scmp.lt.u32.totalorder %s93_s27, %s209_s1 }
  0x17   :  { %p99_p10 = pnand %p97_p9, %p94_p8 }
  0x19   :  { %102 = shalt.err (!%p99_p10)
}
  0x1a   :  { %s103_s4 = scalar_lea.vmem %s28_s24, 256  ;;  %p108_p12 = scmp.lt.s32.totalorder %s28_s24, %s28_s24 }
  0x1b   :  { %p104_p11 = scmp.ne.s32.totalorder %s28_s24, %s103_s4  ;;  %p109_p13 = scmp.lt.s32.totalorder %s103_s4, %s103_s4 }
  0x1d   :  { %p110_p0 = por %p109_p13, %p108_p12 }
  0x1f   :  { %p111_p1 = pnand %p110_p0, %p104_p11 }
  0x21   :  { %114 = shalt.err (!%p111_p1)
}
  0x22   :  { %33 = dma.hbm_to_vmem [thread:$0]  %s209_s1, 256, %s28_s24, [#allocation6], %s144_s19, %s144_s19, %s145_s20  }
  0x23   :  { %137 = dma.done.wait [#allocation3], 256  }
  0x24   :  { %138 = vsyncadd [#allocation3], 4294967040 }
  0x25   :  { %139 = dma.done.wait [#allocation6], 256  }
  0x26   :  { %140 = vsyncadd [#allocation6], 4294967040  ;;  %s147_s6 = smov [#allocation7]   ;;  %v40_v0 = vld [vmem:[#allocation2] sm:$0xff]  ;;  %v42_v1 = vld [vmem:[#allocation5] sm:$0xff] }
  0x27   :  { %s53_s7 = sshll.u32 %s147_s6, 4  ;;  %v41_v2 = vld [vmem:[#allocation2 + $0x8] sm:$0xff]  ;;  %v44_v3 = vadd.f32 %v42_v1, %v40_v0  ;;  %v43_v4 = vld [vmem:[#allocation5 + $0x8] sm:$0xff]  ;;  %s54_s7 = int_to_ptr.vmem [resolvable:$true] %s53_s7 }
  0x28   :  { %v45_v5 = vadd.f32 %v43_v4, %v41_v2  ;;  %s115_s8 = scalar_lea.vmem %s54_s7, 256  ;;  %p120_p3 = scmp.lt.s32.totalorder %s54_s7, %s54_s7 }
  0x29   :  { %46 = vst [vmem:[#allocation7] sm:$0xff] %v44_v3  ;;  %p116_p2 = scmp.ne.s32.totalorder %s54_s7, %s115_s8  ;;  %p121_p4 = scmp.lt.s32.totalorder %s115_s8, %s115_s8 }
  0x2a   :  { %47 = vst [vmem:[#allocation7 + $0x8] sm:$0xff] %v45_v5 }
  0x2b   :  { %p122_p5 = por %p121_p4, %p120_p3 }
  0x2d   :  { %p123_p6 = pnand %p122_p5, %p116_p2 }
  0x2f   :  { %126 = shalt.err (!%p123_p6)
}
  0x30   :  { %s127_s10 = scalar_lea.hbm %s210_s2, 256 }
  0x31   :  { %p128_p7 = scmp.ne.s32.totalorder %s210_s2, %s127_s10  ;;  %p131_p8 = scmp.lt.u32.totalorder %s127_s10, %s210_s2 }
  0x33   :  { %p133_p9 = pnand %p131_p8, %p128_p7 }
  0x35   :  { %136 = shalt.err (!%p133_p9)
}
  0x36   :  { %59 = dma.vmem_to_hbm [thread:$0]  %s54_s7, 256, %s210_s2, [#allocation4], %s144_s19, %s144_s19, %s145_s20  }
  0x37   :  { %141 = dma.done.wait [#allocation4], 256  }
  0x38   :  { %142 = vsyncadd [#allocation4], 4294967040 }
  0x39   :  { %63 = vsyncpa [#allocation3], 1 }
  0x3a   :  { %64 = vsyncpa [#allocation6], 1 }
  0x3b   :  { %65 = vsyncpa [#allocation4], 1 }

</bundles_post_ra>
